<compile_context>
chip_gen: v5e
topology: v5e:2x2
jax: 0.10.0
libtpu: 0.0.40
codegen_flags: <defaults>
</compile_context>

<pallas_src>
import jax
import jax.numpy as jnp
from jax import lax
from jax.experimental import pallas as pl
from jax.experimental.pallas import tpu as pltpu

BRANCH_CH = 32                 # each branch outputs 32 channels
CONCAT_CH = 3 * BRANCH_CH      # 96
OUT_CH = CONCAT_CH             # residual width must equal concat width for the add
PAD_CH = 128                   # lane-dense padded channel width
FUSED_CH = 2 * PAD_CH          # [concat(96)+pad32 | residual(96)+pad32] = 256
BN_EPS = 1e-5


def _round_up(a, b):
    return (a + b - 1) // b * b


def _residual_block_kernel(xe_ref, xen_ref, xo_ref, w0_ref, wm_ref, wp_ref, b_ref, o_ref):
    # xe_ref : (1, TL, C_in)  x_pad[2l]        (left tap of the k=3 conv)
    # xen_ref: (1, 8,  C_in)  x_pad[2*(t0+TL)] in row 0 (next tile's first even row)
    # xo_ref : (1, TL, C_in)  x_pad[2l+1]      (centre tap; also the 1x1 convs' input)
    # w0_ref : (C_in, 256)    centre-tap slab, columns [b1|b2_mid|b3|0 | res|0]
    # wm_ref : (C_in, 128)    left-tap slab, only branch2 columns (32:64) nonzero
    # wp_ref : (C_in, 128)    right-tap slab, only branch2 columns (32:64) nonzero
    # b_ref  : (1, 256)       fused bias (conv bias + folded BN)
    # o_ref  : (1, TL, 128)   lane-dense output tile (channels 96..127 are zero)
    xe = xe_ref[0]                                     # (TL, C_in)
    xo = xo_ref[0]                                     # (TL, C_in)
    xnext = xen_ref[0]                                 # (8, C_in)

    # Right tap x_pad[2l+2] = x_even shifted up by one row, last row from xnext.
    xp = jnp.concatenate([xe[1:], xnext[0:1]], axis=0)  # (TL, C_in)

    y = jnp.dot(xo, w0_ref[...], preferred_element_type=jnp.float32)
    y = y + b_ref[...].astype(jnp.float32)             # (TL, 256)

    side = jnp.dot(xe, wm_ref[...], preferred_element_type=jnp.float32)
    side = side + jnp.dot(xp, wp_ref[...], preferred_element_type=jnp.float32)  # (TL, 128)

    concat = jnp.maximum(y[:, :PAD_CH] + side, 0.0)     # relu(b1|b2|b3|0)
    res = y[:, PAD_CH:]                                 # residual (BN only) | 0
    o_ref[0] = jnp.maximum(concat + res, 0.0)


def _fold_bn(w, b, gamma, beta, mean, var):
    """Fold eval-mode BatchNorm1d into conv weight (O, ...) and bias (O,)."""
    scale = gamma / jnp.sqrt(var + BN_EPS)
    w_eff = w * scale.reshape((-1,) + (1,) * (w.ndim - 1))
    b_eff = (b - mean) * scale + beta
    return w_eff, b_eff


def init_params(key, in_ch):
    """nn.Conv1d-style uniform(+-1/sqrt(fan_in)) init; BatchNorm1d default stats."""
    ks = jax.random.split(key, 8)

    def conv_init(kw, kb, out_c, in_c, ksize):
        bound = 1.0 / jnp.sqrt(jnp.asarray(in_c * ksize, jnp.float32))
        w = jax.random.uniform(kw, (out_c, in_c, ksize), jnp.float32, -bound, bound)
        b = jax.random.uniform(kb, (out_c,), jnp.float32, -bound, bound)
        return w, b

    w1, b1 = conv_init(ks[0], ks[1], BRANCH_CH, in_ch, 1)
    w2, b2 = conv_init(ks[2], ks[3], BRANCH_CH, in_ch, 3)
    w3, b3 = conv_init(ks[4], ks[5], BRANCH_CH, in_ch, 1)
    wr, br = conv_init(ks[6], ks[7], OUT_CH, in_ch, 1)

    def bn(c):
        return (jnp.ones((c,), jnp.float32), jnp.zeros((c,), jnp.float32),
                jnp.zeros((c,), jnp.float32), jnp.ones((c,), jnp.float32))

    return dict(w1=w1, b1=b1, bn1=bn(BRANCH_CH),
                w2=w2, b2=b2, bn2=bn(BRANCH_CH),
                w3=w3, b3=b3, bn3=bn(BRANCH_CH),
                wr=wr, br=br, bnr=bn(OUT_CH))


def _build_slabs(params, c_in):
    """Fused, BN-folded weight slabs.

    W0 (C_in, 256): centre tap -> [b1 | b2_mid | b3 | 0 ->128 | residual | 0 ->256]
    Wm/Wp (C_in, 128): left/right taps, only branch2 columns (32:64) nonzero.
    bias (1, 256): conv bias + folded BN, same column layout as W0.
    """
    w1, b1 = _fold_bn(params["w1"][:, :, 0], params["b1"], *params["bn1"])  # (32, C_in)
    w3, b3 = _fold_bn(params["w3"][:, :, 0], params["b3"], *params["bn3"])
    wr, br = _fold_bn(params["wr"][:, :, 0], params["br"], *params["bnr"])  # (96, C_in)
    w2, b2 = _fold_bn(params["w2"], params["b2"], *params["bn2"])           # (32, C_in, 3)

    w0 = jnp.zeros((c_in, FUSED_CH), jnp.float32)
    w0 = w0.at[:, 0:BRANCH_CH].set(w1.T)
    w0 = w0.at[:, BRANCH_CH:2 * BRANCH_CH].set(w2[:, :, 1].T)
    w0 = w0.at[:, 2 * BRANCH_CH:CONCAT_CH].set(w3.T)
    w0 = w0.at[:, PAD_CH:PAD_CH + OUT_CH].set(wr.T)

    wm = jnp.zeros((c_in, PAD_CH), jnp.float32)
    wm = wm.at[:, BRANCH_CH:2 * BRANCH_CH].set(w2[:, :, 0].T)
    wp = jnp.zeros((c_in, PAD_CH), jnp.float32)
    wp = wp.at[:, BRANCH_CH:2 * BRANCH_CH].set(w2[:, :, 2].T)

    bias = jnp.zeros((1, FUSED_CH), jnp.float32)
    bias = bias.at[0, 0:BRANCH_CH].set(b1)
    bias = bias.at[0, BRANCH_CH:2 * BRANCH_CH].set(b2)
    bias = bias.at[0, 2 * BRANCH_CH:CONCAT_CH].set(b3)
    bias = bias.at[0, PAD_CH:PAD_CH + OUT_CH].set(br)
    return w0, wm, wp, bias


def residual_block_forward(x_ncl, params, *, tile_l=512, use_bf16=False):
    """x_ncl: (N, C_in, L) float32 -> (N, 96, L_out) float32 (PyTorch NCL layout).

    tile_l: length-tile size (multiple of 8).  512 keeps the double-buffered
    working set (two input tiles, output tile, resident weights) far below the
    32 MiB scoped VMEM limit for C_in up to ~1K on v5e/v6e/v7x.
    """
    n, c_in, l = x_ncl.shape
    l_out = (l - 1) // 2 + 1                     # stride 2; same for k=1 and k=3(pad=1)

    tl = min(tile_l, _round_up(l_out, 8))        # multiple of 8
    num_tiles = -(-l_out // tl)
    l_out_pad = num_tiles * tl
    le = l_out_pad + 8                           # even-phase rows (incl. next-row blocks)
    lo = l_out_pad                               # odd-phase rows

    # Padded NLC input, de-interleaved into stride-2 phases (~1x the input in HBM).
    x_nlc = jnp.transpose(x_ncl, (0, 2, 1))                       # (N, L, C_in)
    lp = 2 * le                                                   # >= L + 1 always
    x_pad = jnp.pad(x_nlc, ((0, 0), (1, lp - l - 1), (0, 0)))     # zero pad (conv pad=1)
    x_even = x_pad[:, 0::2, :][:, :le, :]                         # x_pad[2l]   -> (N, LE, C_in)
    x_odd = x_pad[:, 1::2, :][:, :lo, :]                          # x_pad[2l+1] -> (N, LO, C_in)

    w0, wm, wp, bias = _build_slabs(params, c_in)

    if use_bf16:  # halves HBM traffic; MXU still accumulates in f32.
        x_even = x_even.astype(jnp.bfloat16)
        x_odd = x_odd.astype(jnp.bfloat16)
        w0, wm, wp = (w.astype(jnp.bfloat16) for w in (w0, wm, wp))

    out_nlc = pl.pallas_call(
        _residual_block_kernel,
        out_shape=jax.ShapeDtypeStruct((n, l_out_pad, PAD_CH), jnp.float32),
        grid=(n, num_tiles),
        in_specs=[
            pl.BlockSpec((1, tl, c_in), lambda i, j: (i, j, 0)),                   # x_even tile
            pl.BlockSpec((1, 8, c_in), lambda i, j: (i, (j + 1) * (tl // 8), 0)),  # next even row
            pl.BlockSpec((1, tl, c_in), lambda i, j: (i, j, 0)),                   # x_odd tile
            pl.BlockSpec((c_in, FUSED_CH), lambda i, j: (0, 0)),                   # W0 (resident)
            pl.BlockSpec((c_in, PAD_CH), lambda i, j: (0, 0)),                     # Wm (resident)
            pl.BlockSpec((c_in, PAD_CH), lambda i, j: (0, 0)),                     # Wp (resident)
            pl.BlockSpec((1, FUSED_CH), lambda i, j: (0, 0)),                      # bias
        ],
        out_specs=pl.BlockSpec((1, tl, PAD_CH), lambda i, j: (i, j, 0)),
        compiler_params=pltpu.CompilerParams(
            dimension_semantics=("parallel", "parallel"),
            vmem_limit_bytes=32 * 1024 * 1024,
        ),
    )(x_even, x_even, x_odd, w0, wm, wp, bias)

    out = out_nlc[:, :l_out, :OUT_CH]            # drop L padding + 32 padded channels
    # TODO(synk): keep NLC end-to-end if the downstream consumer allows it; the
    # transpose below exists only to match the PyTorch (N, C, L) contract.
    return jnp.transpose(out, (0, 2, 1))


def _reference_forward(x_ncl, params):
    """Independent plain-JAX reference with PyTorch Conv1d/BatchNorm1d(eval) semantics."""
    def conv1d(x, w, b, stride, padding):
        y = lax.conv_general_dilated(
            x, w, window_strides=(stride,), padding=[(padding, padding)],
            dimension_numbers=("NCH", "OIH", "NCH"))
        return y + b[None, :, None]

    def bn(y, gamma, beta, mean, var):
        return ((y - mean[None, :, None]) / jnp.sqrt(var[None, :, None] + BN_EPS)
                * gamma[None, :, None] + beta[None, :, None])

    b1 = jax.nn.relu(bn(conv1d(x_ncl, params["w1"], params["b1"], 2, 0), *params["bn1"]))
    b2 = jax.nn.relu(bn(conv1d(x_ncl, params["w2"], params["b2"], 2, 1), *params["bn2"]))
    b3 = jax.nn.relu(bn(conv1d(x_ncl, params["w3"], params["b3"], 2, 0), *params["bn3"]))
    res = bn(conv1d(x_ncl, params["wr"], params["br"], 2, 0), *params["bnr"])
    return jax.nn.relu(jnp.concatenate([b1, b2, b3], axis=1) + res)


if __name__ == "__main__":
    key = jax.random.PRNGKey(0)
    k_x, k_p = jax.random.split(key)

    N, IN_CH, L = 2, 4, 16                      # small shapes consistent with the module
    x = jax.random.normal(k_x, (N, IN_CH, L), jnp.float32)
    params = init_params(k_p, IN_CH)

    out = jax.block_until_ready(residual_block_forward(x, params))
    ref = _reference_forward(x, params)

    assert out.shape == (N, OUT_CH, (L - 1) // 2 + 1), out.shape
    assert jnp.allclose(out, ref, atol=2e-4, rtol=2e-4), \
        f"mismatch vs. reference, max abs err {float(jnp.max(jnp.abs(out - ref)))}"

    print("KERNEL_OK")
</pallas_src>

<mosaic_0001>
module attributes {stable_mosaic.version = 11 : i64} {
  func.func @_residual_block_kernel(%arg0: i32, %arg1: i32, %arg2: memref<1x8x4xf32, #tpu.memory_space<vmem>>, %arg3: memref<1x8x4xf32, #tpu.memory_space<vmem>>, %arg4: memref<1x8x4xf32, #tpu.memory_space<vmem>>, %arg5: memref<4x256xf32, #tpu.memory_space<vmem>>, %arg6: memref<4x128xf32, #tpu.memory_space<vmem>>, %arg7: memref<4x128xf32, #tpu.memory_space<vmem>>, %arg8: memref<1x256xf32, #tpu.memory_space<vmem>>, %arg9: memref<1x8x128xf32, #tpu.memory_space<vmem>>) attributes {dimension_semantics = [#tpu.dimension_semantics<parallel>, #tpu.dimension_semantics<parallel>], iteration_bounds = array<i64: 2, 1>, scalar_prefetch = 0 : i64, scratch_operands = 0 : i64, tpu.core_type = #tpu.core_type<tc>, window_params = [{transform_indices = @transform_0, window_bounds = array<i64: 1, 8, 4>}, {transform_indices = @transform_1, window_bounds = array<i64: 1, 8, 4>}, {transform_indices = @transform_2, window_bounds = array<i64: 1, 8, 4>}, {pipeline_mode = #tpu.pipeline_mode<synchronous>, transform_indices = @transform_3, window_bounds = array<i64: 4, 256>}, {pipeline_mode = #tpu.pipeline_mode<synchronous>, transform_indices = @transform_4, window_bounds = array<i64: 4, 128>}, {pipeline_mode = #tpu.pipeline_mode<synchronous>, transform_indices = @transform_5, window_bounds = array<i64: 4, 128>}, {pipeline_mode = #tpu.pipeline_mode<synchronous>, transform_indices = @transform_6, window_bounds = array<i64: 1, 256>}, {transform_indices = @transform_7, window_bounds = array<i64: 1, 8, 128>}]} {
    %c0 = arith.constant 0 : index
    %c0_0 = arith.constant 0 : index
    %c0_1 = arith.constant 0 : index
    %0 = vector.load %arg2[%c0, %c0_0, %c0_1] : memref<1x8x4xf32, #tpu.memory_space<vmem>>, vector<1x8x4xf32>
    %1 = vector.shape_cast %0 : vector<1x8x4xf32> to vector<8x4xf32>
    %c0_2 = arith.constant 0 : index
    %c0_3 = arith.constant 0 : index
    %c0_4 = arith.constant 0 : index
    %2 = vector.load %arg4[%c0_2, %c0_3, %c0_4] : memref<1x8x4xf32, #tpu.memory_space<vmem>>, vector<1x8x4xf32>
    %3 = vector.shape_cast %2 : vector<1x8x4xf32> to vector<8x4xf32>
    %c0_5 = arith.constant 0 : index
    %c0_6 = arith.constant 0 : index
    %c0_7 = arith.constant 0 : index
    %4 = vector.load %arg3[%c0_5, %c0_6, %c0_7] : memref<1x8x4xf32, #tpu.memory_space<vmem>>, vector<1x8x4xf32>
    %5 = vector.shape_cast %4 : vector<1x8x4xf32> to vector<8x4xf32>
    %6 = vector.extract_strided_slice %1 {offsets = [1, 0], sizes = [7, 4], strides = [1, 1]} : vector<8x4xf32> to vector<7x4xf32>
    %7 = vector.extract_strided_slice %5 {offsets = [0, 0], sizes = [1, 4], strides = [1, 1]} : vector<8x4xf32> to vector<1x4xf32>
    %8 = tpu.concatenate %6, %7 in 0 : vector<7x4xf32>, vector<1x4xf32> -> vector<8x4xf32>
    %c0_8 = arith.constant 0 : index
    %c0_9 = arith.constant 0 : index
    %9 = vector.load %arg5[%c0_8, %c0_9] : memref<4x256xf32, #tpu.memory_space<vmem>>, vector<4x256xf32>
    %cst = arith.constant dense<0.000000e+00> : vector<8x256xf32>
    %10 = tpu.matmul %3, %9, %cst {dimension_numbers = #tpu.dot_dimension_numbers<[1], [0], [0], [1], [0, 0, 1, 1], [], []>} : vector<8x4xf32>, vector<4x256xf32>, vector<8x256xf32> -> vector<8x256xf32>
    %c0_10 = arith.constant 0 : index
    %c0_11 = arith.constant 0 : index
    %11 = vector.load %arg8[%c0_10, %c0_11] : memref<1x256xf32, #tpu.memory_space<vmem>>, vector<1x256xf32>
    %12 = vector.broadcast %11 : vector<1x256xf32> to vector<8x256xf32>
    %13 = arith.addf %10, %12 : vector<8x256xf32>
    %c0_12 = arith.constant 0 : index
    %c0_13 = arith.constant 0 : index
    %14 = vector.load %arg6[%c0_12, %c0_13] : memref<4x128xf32, #tpu.memory_space<vmem>>, vector<4x128xf32>
    %cst_14 = arith.constant dense<0.000000e+00> : vector<8x128xf32>
    %15 = tpu.matmul %1, %14, %cst_14 {dimension_numbers = #tpu.dot_dimension_numbers<[1], [0], [0], [1], [0, 0, 1, 1], [], []>} : vector<8x4xf32>, vector<4x128xf32>, vector<8x128xf32> -> vector<8x128xf32>
    %c0_15 = arith.constant 0 : index
    %c0_16 = arith.constant 0 : index
    %16 = vector.load %arg7[%c0_15, %c0_16] : memref<4x128xf32, #tpu.memory_space<vmem>>, vector<4x128xf32>
    %cst_17 = arith.constant dense<0.000000e+00> : vector<8x128xf32>
    %17 = tpu.matmul %8, %16, %cst_17 {dimension_numbers = #tpu.dot_dimension_numbers<[1], [0], [0], [1], [0, 0, 1, 1], [], []>} : vector<8x4xf32>, vector<4x128xf32>, vector<8x128xf32> -> vector<8x128xf32>
    %18 = arith.addf %15, %17 : vector<8x128xf32>
    %19 = vector.extract_strided_slice %13 {offsets = [0, 0], sizes = [8, 128], strides = [1, 1]} : vector<8x256xf32> to vector<8x128xf32>
    %20 = arith.addf %19, %18 : vector<8x128xf32>
    %cst_18 = arith.constant 0.000000e+00 : f32
    %21 = vector.broadcast %cst_18 : f32 to vector<8x128xf32>
    %22 = arith.maximumf %20, %21 : vector<8x128xf32>
    %23 = vector.extract_strided_slice %13 {offsets = [0, 128], sizes = [8, 128], strides = [1, 1]} : vector<8x256xf32> to vector<8x128xf32>
    %24 = arith.addf %22, %23 : vector<8x128xf32>
    %cst_19 = arith.constant 0.000000e+00 : f32
    %25 = vector.broadcast %cst_19 : f32 to vector<8x128xf32>
    %26 = arith.maximumf %24, %25 : vector<8x128xf32>
    %c0_20 = arith.constant 0 : index
    %c0_21 = arith.constant 0 : index
    %c0_22 = arith.constant 0 : index
    %27 = vector.load %arg9[%c0_20, %c0_21, %c0_22] : memref<1x8x128xf32, #tpu.memory_space<vmem>>, vector<1x8x128xf32>
    %28 = vector.shape_cast %27 : vector<1x8x128xf32> to vector<8x128xf32>
    %29 = vector.shape_cast %26 : vector<8x128xf32> to vector<1x8x128xf32>
    tpu.vector_store %arg9[%c0_20, %c0_21, %c0_22], %29 {strides = array<i32>} : memref<1x8x128xf32, #tpu.memory_space<vmem>>, vector<1x8x128xf32>,
    return
  }
  func.func @transform_0(%arg0: i32, %arg1: i32) -> (i32, i32, i32) {
    %c0_i32 = arith.constant 0 : i32
    %c0_i32_0 = arith.constant 0 : i32
    return %arg0, %arg1, %c0_i32 : i32, i32, i32
  }
  func.func @transform_1(%arg0: i32, %arg1: i32) -> (i32, i32, i32) {
    %c1_i32 = arith.constant 1 : i32
    %0 = arith.addi %arg1, %c1_i32 : i32
    %c1_i32_0 = arith.constant 1 : i32
    %1 = arith.muli %0, %c1_i32_0 : i32
    %c0_i32 = arith.constant 0 : i32
    %c0_i32_1 = arith.constant 0 : i32
    return %arg0, %1, %c0_i32 : i32, i32, i32
  }
  func.func @transform_2(%arg0: i32, %arg1: i32) -> (i32, i32, i32) {
    %c0_i32 = arith.constant 0 : i32
    %c0_i32_0 = arith.constant 0 : i32
    return %arg0, %arg1, %c0_i32 : i32, i32, i32
  }
  func.func @transform_3(%arg0: i32, %arg1: i32) -> (i32, i32) {
    %c0_i32 = arith.constant 0 : i32
    %c0_i32_0 = arith.constant 0 : i32
    %c0_i32_1 = arith.constant 0 : i32
    return %c0_i32, %c0_i32_0 : i32, i32
  }
  func.func @transform_4(%arg0: i32, %arg1: i32) -> (i32, i32) {
    %c0_i32 = arith.constant 0 : i32
    %c0_i32_0 = arith.constant 0 : i32
    %c0_i32_1 = arith.constant 0 : i32
    return %c0_i32, %c0_i32_0 : i32, i32
  }
  func.func @transform_5(%arg0: i32, %arg1: i32) -> (i32, i32) {
    %c0_i32 = arith.constant 0 : i32
    %c0_i32_0 = arith.constant 0 : i32
    %c0_i32_1 = arith.constant 0 : i32
    return %c0_i32, %c0_i32_0 : i32, i32
  }
  func.func @transform_6(%arg0: i32, %arg1: i32) -> (i32, i32) {
    %c0_i32 = arith.constant 0 : i32
    %c0_i32_0 = arith.constant 0 : i32
    %c0_i32_1 = arith.constant 0 : i32
    return %c0_i32, %c0_i32_0 : i32, i32
  }
  func.func @transform_7(%arg0: i32, %arg1: i32) -> (i32, i32, i32) {
    %c0_i32 = arith.constant 0 : i32
    %c0_i32_0 = arith.constant 0 : i32
    return %arg0, %arg1, %c0_i32 : i32, i32, i32
  }
}

</mosaic_0001>

<bundles_post_ra>
// kernel: tpu_custom_call.1
= control target key start
LH: loop header
LB: loop body
LE: loop exit
PB: predicated region body
PF: predicated region fallthrough
CT: control target
= control target key end

     0   :  { %s946_s0 = inlined_call_operand.vmem [shape: f32[2,16,4], index: 0, kind: input, shape index: {}]   ;;  %s947_s1 = inlined_call_operand.vmem [shape: f32[2,16,4], index: 1, kind: input, shape index: {}]   ;;  %s948_s2 = inlined_call_operand.vmem [shape: f32[2,8,4], index: 2, kind: input, shape index: {}]   ;;  %s949_s3 = inlined_call_operand.vmem [shape: f32[4,256], index: 3, kind: input, shape index: {}]   ;;  %s950_s4 = inlined_call_operand.vmem [shape: f32[4,128], index: 4, kind: input, shape index: {}]   ;;  %s951_s5 = inlined_call_operand.vmem [shape: f32[4,128], index: 5, kind: input, shape index: {}]   ;;  %s952_s6 = inlined_call_operand.vmem [shape: f32[1,256], index: 6, kind: input, shape index: {}]   ;;  %s953_s7 = inlined_call_operand.hbm [shape: f32[2,8,128], index: 7, kind: output, shape index: {}]  }
   0x1   :  { %954 = sst [smem:[#allocation5_spill]] %s950_s4 }
   0x2   :  { %12 = vsyncpa [#allocation3], 0 }
   0x3   :  { %14 = vsyncpa [#allocation3 + $0x1], 0  ;;  %s823_s24 = smov 0   ;;  %s825_s25 = smov 0  }
   0x4   :  { %s827_s26 = smov 0   ;;  %s829_s27 = smov 0  }
   0x5   :  { %s831_s28 = smov 0   ;;  %s833_s29 = smov 0  }
   0x6 LB: > { %s621_s30 = sadd.s32 4294967295, %s781_s29   ;;  %s622_s8 = sadd.s32 4294967294, %s781_s29   ;;  %s781_s29 = sphi %s833_s29, %s20_s29   ;;  %s777_s28 = sphi %s831_s28, %s962_s28   ;;  %s773_s27 = sphi %s829_s27, %s961_s27   ;;  %s769_s26 = sphi %s827_s26, %s960_s26   ;;  %s765_s25 = sphi %s825_s25, %s959_s25   ;;  %s761_s24 = sphi %s823_s24, %s958_s24  }
   0x7   : > { %s32_s9 = sadd.s32 1, %s777_s28  ;;  %s211_s10 = sadd.s32 1, %s769_s26 }
   0x8   : > { %p34_p0 = scmp.ge.s32.totalorder %s32_s9, 2  ;;  %p221_p1 = scmp.ne.s32.totalorder %s769_s26, %s765_s25 }
   0x9   : > { %p222_p2 = scmp.eq.s32.totalorder %s621_s30, 1  ;;  %p227_p3 = scmp.ne.s32.totalorder %s765_s25, %s761_s24 }
   0xa   : > { %s964_s9 = smov (%p34_p0, %s32_s9), 0  ;;  %p228_p5 = scmp.eq.s32.totalorder %s622_s8, 1 }
   0xb   : > { %p863_p4 = por %p222_p2, %p221_p1  ;;  %s206_s12 = ssub.s32 %s777_s28, %s964_s9 }
   0xc   : > { %p625_p6 = scmp.ge.s32.totalorder %s781_s29, 1  ;;  %p209_p7 = scmp.eq.s32.totalorder %s206_s12, 0 }
   0xd   : > { %p870_p8 = por %p228_p5, %p227_p3  ;;  %p292_p9 = scmp.lt.s32.totalorder %s781_s29, 3 }
   0xe   : > { %s876_s14 = scalar_select %p209_p7, %s769_s26, %s211_s10  }
   0xf   : > { %p293_p10 = pnand %p625_p6, %p292_p9 }
  0x10   : > { %s957_s4 = sld [smem:[#allocation5_spill]] (!%p293_p10)  ;;  %p343_p11 = scmp.lt.s32.totalorder (!%p293_p10), %s773_s27, 1 }
  0x11   : > { %296 = sbr.rel (%p293_p10) target bundleno = 176 (0xb0), region = 48  ;;  %s723_s20 = scalar_lea.hbm (!%p293_p10), %s953_s7, 16 }
  0x16   : > { %vm394_vm0 = vcmask 1043456   ;;  %v440_v0 = vld [vmem:[%s951_s5] sm:$0xf]  ;;  %s344_s21 = scalar_select %p343_p11, %s773_s27, 1  ;;  %vm390_vm1 = vcmask 31744   ;;  %vm377_vm2 = vcmask 1046528  }
  0x17   : > { %v439_v1 = vld [vmem:[%s957_s4] sm:$0xf]  ;;  %636 = vmatpush.msk.msra.mxu2 %vm394_vm0, %v440_v0 }
  0x18   : > { %638 = vmatpush.msk.msra.mxu3 %vm394_vm0, %v439_v1  ;;  %v379_v2 = vld [vmem:[%s949_s3] sm:$0xff]  ;;  %s644_s22 = sshll.u32 %s344_s21, 4  ;;  %s631_s23 = sshll.u32 %s344_s21, 3 }
  0x19   : > { %387 = vst [vmem:[#allocation1] ss:$2 sm:$0xff] %v379_v2  ;;  %s350_s10 = scalar_lea.vmem %s946_s0, %s644_s22  ;;  %s646_s12 = sadd.s32 8, %s644_s22  ;;  %v380_v11 = vld [vmem:[%s952_s6] sm:$0x3] }
  0x1a   : > { %s359_s17 = scalar_lea.vmem %s947_s1, %s646_s12  ;;  %v368_v3 = vld [vmem:[%s350_s10] sm:$0xff]  ;;  %s367_s19 = scalar_lea.vmem %s948_s2, %s631_s23  ;;  %v382_v12 = vperm.slane %v380_v11, 0  ;;  %v383_v16 = vperm.slane %v380_v11, 1 }
  0x1b   : > { %v370_v4 = vld [vmem:[%s359_s17] sm:$0xff]  ;;  %v372_v5 = vrot.slane %v368_v3, 1  ;;  %639 = vmatmul.msk.f32.vlgmr.msra.gmra.mxu3 %vm390_vm1, %v368_v3  ;;  %s340_s21 = sand.u32 1, %s765_s25   ;;  %s641_s23 = sshll.u32 %s773_s27, 3 }
  0x1c   : > { %v375_v6 = vrot.slane %v370_v4, 1  ;;  %v369_v7 = vld [vmem:[%s367_s19] sm:$0xff]  ;;  %s626_s22 = sshll.u32 %s340_s21, 3  ;;  %s509_s10 = scalar_lea.hbm %s953_s7, %s641_s23 }
  0x1d   : > { %s342_s12 = scalar_lea.vmem [#allocation2], %s626_s22  ;;  %s513_s16 = sshll.u32 %s509_s10, 4  ;;  %s514_s16 = int_to_ptr.hbm [resolvable:$true] %s513_s16 }
  0x1e   : > { %v378_v10 = vsel %vm377_vm2, %v372_v5, %v375_v6  ;;  %s511_s15 = sshll.u32 %s342_s12, 4  ;;  %s498_s17 = scalar_lea.sflag [#allocation3], %s340_s21  ;;  %s512_s15 = int_to_ptr.vmem [resolvable:$true] %s511_s15 }
  0x1f   : > { %637 = vmatmul.msk.f32.vlgmr.msra.gmra.mxu2 %vm390_vm1, %v378_v10  ;;  %s717_s18 = sshra.s32 %s514_s16, 4  ;;  %s718_s18 = int_to_ptr.hbm [resolvable:$true] %s717_s18 }
  0x20   : > { %v388_v8 = vld.sshfl [vmem:[#allocation1] sm:$0xff pattern:$0x75316420]  ;;  %v389_v9 = vld.sshfl [vmem:[#allocation1 + $0x8] sm:$0xff pattern:$0x75316420]  ;;  %p724_p1 = scmp.lt.s32.totalorder %s718_s18, %s953_s7 }
  0x21   : > { %632 = vmatpush.msk.msra.mxu0 %vm394_vm0, %v388_v8  ;;  %634 = vmatpush.msk.msra.mxu1 %vm394_vm0, %v389_v9  ;;  %s719_s27 = scalar_lea.hbm %s718_s18, 8 }
  0x22   : > { %633 = vmatmul.msk.f32.vlgmr.msra.gmra.mxu0 %vm390_vm1, %v369_v7  ;;  %635 = vmatmul.msk.f32.vlgmr.msra.gmra.mxu1 %vm390_vm1, %v369_v7  ;;  %p720_p12 = scmp.ne.s32.totalorder %s718_s18, %s719_s27  ;;  %p725_p2 = scmp.lt.s32.totalorder %s723_s20, %s719_s27 }
  0x24   : > { %p721_p13 = pnand %p720_p12, %p863_p4  ;;  %p726_p3 = por %p725_p2, %p724_p1 }
  0x26   : > { %p722_p0 = pneg %p721_p13 }
  0x28   : > { %p727_p5 = pnand %p726_p3, %p722_p0 }
  0x9e   : > { %v489_v14 = vpop.f32.mrf.mxu3 }
  0x9f   : > { %v416_v13 = vpop.f32.mrf.mxu0  ;;  %v436_v18 = vpop.f32.mrf.mxu1 }
  0xa0   : > { %v417_v15 = vadd.f32 %v416_v13, %v382_v12  ;;  %v437_v21 = vadd.f32 %v436_v18, %v383_v16 }
  0xa2   : > { %v464_v17 = vpop.f32.mrf.mxu2 }
  0xa3   : > { %v490_v19 = vadd.f32 %v489_v14, %v464_v17 }
  0xa5   : > { %v492_v20 = vadd.f32 %v490_v19, %v417_v15 }
  0xa7   : > { %v493_v22 = vmax.f32 %v492_v20, 0.0 }
  0xa9   : > { %v494_v23 = vadd.f32 %v493_v22, %v437_v21 }
  0xab   : > { %v495_v24 = vmax.f32 %v494_v23, 0.0 }
  0xad   : > { %496 = vst [vmem:[%s342_s12] sm:$0xff] %v495_v24 }
  0xae   : > { %730 = shalt.err (!%p727_p5)
}
  0xaf   : > { %648 = dma.vmem_to_hbm [thread:$0]  (%p863_p4), %s512_s15, 128, %s514_s16, %s498_s17  }
  0xb0 PF: > { %p654_p6 = scmp.ge.s32.totalorder %s781_s29, 2  ;;  %s525_s21 = sand.u32 1, %s761_s24  }
  0xb1   : > { %s526_s30 = scalar_lea.sflag [#allocation3], %s525_s21 }
  0xb2   : > { %p651_p7 = pnand %p654_p6, %p870_p8 }
  0xb4   : > { %p652_p9 = pneg %p651_p7 }
  0xb6   : > { %756 = dma.done.wait (%p652_p9), %s526_s30, 128  }
  0xb7   : > { %758 = vsyncadd (%p652_p9), %s526_s30, 4294967168  ;;  %s20_s29 = sadd.s32 1, %s781_s29   ;;  %s958_s24 = smov %s765_s25 }
  0xb8   : > { %p17_p10 = scmp.ge.s32.totalorder %s20_s29, 4   ;;  %s959_s25 = smov %s769_s26 }
  0xb9   : > { %s960_s26 = smov %s876_s14  ;;  %s961_s27 = smov %s777_s28 }
  0xba   : > { %s962_s28 = smov %s964_s9  ;;  %19 = sbr.rel (!%p17_p10) target bundleno = 6 (0x6), region = 89 }
  0xbf   :  { %532 = vsyncpa [#allocation3], 1 }
  0xc0   :  { %534 = vsyncpa [#allocation3 + $0x1], 1 }

</bundles_post_ra>
